<compile_context>
chip_gen: v7x
topology: tpu7x:2x2x1
jax: 0.10.0
libtpu: 0.0.40
codegen_flags: <defaults>
</compile_context>

<pallas_src>
import functools

import jax
import jax.numpy as jnp
from jax import lax
from jax.experimental import pallas as pl
from jax.experimental.pallas import tpu as pltpu


def _onehot_gather(idx_col, table_ref):
    """table[idx] for a (tm,1) int32 idx column, as a one-hot matmul (MXU)."""
    n = table_ref.shape[0]
    tbl = table_ref[...]
    iota = lax.broadcasted_iota(jnp.int32, (idx_col.shape[0], n), 1)
    onehot = jnp.where(idx_col == iota, 1.0, 0.0).astype(tbl.dtype)
    # bf16 tables: native MXU pass, exact selection (0/1 weights).
    # f32 tables: request the exact multi-pass decomposition so table values
    # are not truncated to bf16 by a single-pass matmul.
    prec = lax.Precision.HIGHEST if tbl.dtype == jnp.float32 else None
    return jnp.dot(onehot, tbl, preferred_element_type=jnp.float32,
                   precision=prec)


def _bert_embeddings_kernel(ids_ref, tt_ref, pos_ref,            # (tm,1) int32 tiles
                            word_ref, postab_ref, typetab_ref,   # VMEM-resident tables
                            gamma_ref, beta_ref,                  # (1,H) LN params
                            o_ref,                                # (tm,H) output tile
                            *, eps):
    # --- fused embedding lookups (all vectorized, no per-row loop) ----------
    x = _onehot_gather(ids_ref[...], word_ref)           # word embeddings
    x = x + _onehot_gather(pos_ref[...], postab_ref)     # position embeddings
    # TODO(synk): when position_ids is the default arange, the position term
    # could instead be a contiguous (tm,H) BlockSpec slab add (no gather).

    # token-type: T is tiny (usually 2) -> VPU broadcast-select over the tile.
    tt = tt_ref[...]                                      # (tm,1) int32
    ttab = typetab_ref[...].astype(jnp.float32)           # (T,H)
    for t in range(ttab.shape[0]):                        # static, unrolled
        x = x + jnp.where(tt == t, 1.0, 0.0) * ttab[t:t + 1, :]

    # --- LayerNorm over the hidden axis, f32 math ----------------------------
    mean = jnp.mean(x, axis=-1, keepdims=True)
    centered = x - mean
    var = jnp.mean(centered * centered, axis=-1, keepdims=True)
    y = centered * lax.rsqrt(var + eps)
    y = y * gamma_ref[...].astype(jnp.float32) + beta_ref[...].astype(jnp.float32)
    # Dropout: identity in eval mode.
    o_ref[...] = y.astype(o_ref.dtype)


def _round_up(x, m):
    return pl.cdiv(x, m) * m


def _vmem_capacity_bytes():
    try:
        return int(pltpu.get_tpu_info().vmem_capacity_bytes)
    except Exception:
        return 64 << 20   # conservative: v7x per-TensorCore VMEM


def bert_embeddings(input_ids, word_table, pos_table, type_table, gamma, beta,
                    *, token_type_ids=None, position_ids=None,
                    eps=1e-12, tm=512, out_dtype=None):
    """input_ids: [B,S] int; tables: [V,H],[P,H],[T,H]; gamma/beta: [H]."""
    B, S = input_ids.shape
    V, H = word_table.shape
    P = pos_table.shape[0]
    if out_dtype is None:
        out_dtype = word_table.dtype

    if position_ids is None:
        position_ids = jnp.broadcast_to(
            jnp.arange(S, dtype=jnp.int32)[None, :], (B, S))
    if token_type_ids is None:
        token_type_ids = jnp.zeros((B, S), dtype=jnp.int32)

    M = B * S
    tm = max(8, (tm // 8) * 8)              # sublane-aligned row tile
    tm_eff = min(tm, _round_up(M, 8))       # don't over-tile tiny inputs
    num_tiles = pl.cdiv(M, tm_eff)
    M_pad = num_tiles * tm_eff

    def flat_pad(x):
        x = x.reshape(M).astype(jnp.int32)
        x = jnp.pad(x, (0, M_pad - M))      # pad with index 0 (always valid)
        return x.reshape(M_pad, 1)

    ids2 = flat_pad(input_ids)
    tt2 = flat_pad(token_type_ids)
    pos2 = flat_pad(position_ids)

    gamma2 = gamma.reshape(1, H)
    beta2 = beta.reshape(1, H)

    # --- explicit VMEM budget: per-array itemsize, per-generation capacity cap.
    def nbytes(a):
        return int(a.size) * jnp.dtype(a.dtype).itemsize

    resident = (nbytes(word_table) + nbytes(pos_table) + nbytes(type_table)
                + nbytes(gamma2) + nbytes(beta2))              # single-buffered
    id_tiles = 3 * 2 * tm_eff * 128 * 4                        # lane-padded (tm,1) i32, dbl-buf
    out_tiles = 2 * tm_eff * H * jnp.dtype(out_dtype).itemsize  # dbl-buffered output
    onehot_live = tm_eff * (V + P) * 4                          # in-kernel one-hot values
    needed = resident + id_tiles + out_tiles + onehot_live + (8 << 20)
    cap = (_vmem_capacity_bytes() * 7) // 8   # real headroom (v7x ~56 MiB, v5e/v6e ~112 MiB)
    vmem_limit = int(min(max(needed, 16 << 20), cap))

    kernel = functools.partial(_bert_embeddings_kernel, eps=eps)
    resident_spec = pl.BlockSpec(memory_space=pltpu.MemorySpace.VMEM)
    row_tile = lambda i: (i, 0)

    out = pl.pallas_call(
        kernel,
        out_shape=jax.ShapeDtypeStruct((M_pad, H), out_dtype),
        grid=(num_tiles,),
        in_specs=[
            pl.BlockSpec((tm_eff, 1), row_tile),   # word ids
            pl.BlockSpec((tm_eff, 1), row_tile),   # token-type ids
            pl.BlockSpec((tm_eff, 1), row_tile),   # position ids
            resident_spec,                         # word table       (V,H)
            resident_spec,                         # position table   (P,H)
            resident_spec,                         # token-type table (T,H)
            resident_spec,                         # LN gamma         (1,H)
            resident_spec,                         # LN beta          (1,H)
        ],
        out_specs=pl.BlockSpec((tm_eff, H), row_tile),
        compiler_params=pltpu.CompilerParams(
            dimension_semantics=("parallel",),
            vmem_limit_bytes=vmem_limit,
        ),
    )(ids2, tt2, pos2, word_table, pos_table, type_table, gamma2, beta2)

    return out[:M].reshape(B, S, H)


if __name__ == "__main__":
    # Small config consistent with the module; hidden kept lane-dense (128).
    B, S = 2, 8
    V, H = 64, 128          # vocab_size, hidden_size
    P, T = 32, 2            # max_position_embeddings, type_vocab_size
    eps = 1e-12

    key = jax.random.PRNGKey(0)
    k_ids, k_tt, k_w, k_p, k_t, k_g, k_b = jax.random.split(key, 7)

    input_ids = jax.random.randint(k_ids, (B, S), 0, V, dtype=jnp.int32)
    token_type_ids = jax.random.randint(k_tt, (B, S), 0, T, dtype=jnp.int32)

    # bf16 embedding tables (VMEM-resident strategy); all math stays in f32.
    word_table = (jax.random.normal(k_w, (V, H), dtype=jnp.float32) * 0.02
                  ).astype(jnp.bfloat16)
    word_table = word_table.at[0].set(0.0)   # padding_idx=0 row zero-initialized
    pos_table = (jax.random.normal(k_p, (P, H), dtype=jnp.float32) * 0.02
                 ).astype(jnp.bfloat16)
    type_table = (jax.random.normal(k_t, (T, H), dtype=jnp.float32) * 0.02
                  ).astype(jnp.bfloat16)
    gamma = 1.0 + 0.01 * jax.random.normal(k_g, (H,), dtype=jnp.float32)
    beta = 0.01 * jax.random.normal(k_b, (H,), dtype=jnp.float32)

    out = bert_embeddings(input_ids, word_table, pos_table, type_table,
                          gamma, beta, token_type_ids=token_type_ids,
                          eps=eps, out_dtype=jnp.float32)
    jax.block_until_ready(out)

    # Pure-JAX reference (same bf16 tables, f32 math).
    position_ids = jnp.broadcast_to(jnp.arange(S, dtype=jnp.int32)[None, :], (B, S))
    emb = (word_table[input_ids].astype(jnp.float32)
           + pos_table[position_ids].astype(jnp.float32)
           + type_table[token_type_ids].astype(jnp.float32))
    mu = emb.mean(-1, keepdims=True)
    var = ((emb - mu) ** 2).mean(-1, keepdims=True)
    ref = (emb - mu) * lax.rsqrt(var + eps) * gamma + beta

    assert out.shape == (B, S, H)
    max_err = float(jnp.max(jnp.abs(out - ref)))
    assert jnp.allclose(out, ref, atol=1e-4, rtol=1e-4), (
        f"mismatch vs reference, max abs err={max_err}")

    print("KERNEL_OK")
</pallas_src>

<mosaic_0001>
module attributes {stable_mosaic.version = 11 : i64} {
  func.func @_bert_embeddings_kernel(%arg0: i32, %arg1: memref<16x1xi32, #tpu.memory_space<vmem>>, %arg2: memref<16x1xi32, #tpu.memory_space<vmem>>, %arg3: memref<16x1xi32, #tpu.memory_space<vmem>>, %arg4: memref<64x128xbf16, #tpu.memory_space<vmem>>, %arg5: memref<32x128xbf16, #tpu.memory_space<vmem>>, %arg6: memref<2x128xbf16, #tpu.memory_space<vmem>>, %arg7: memref<1x128xf32, #tpu.memory_space<vmem>>, %arg8: memref<1x128xf32, #tpu.memory_space<vmem>>, %arg9: memref<16x128xf32, #tpu.memory_space<vmem>>) attributes {dimension_semantics = [#tpu.dimension_semantics<parallel>], iteration_bounds = array<i64: 1>, scalar_prefetch = 0 : i64, scratch_operands = 0 : i64, tpu.core_type = #tpu.core_type<tc>, window_params = [{transform_indices = @transform_0, window_bounds = array<i64: 16, 1>}, {transform_indices = @transform_1, window_bounds = array<i64: 16, 1>}, {transform_indices = @transform_2, window_bounds = array<i64: 16, 1>}, {pipeline_mode = #tpu.pipeline_mode<synchronous>, transform_indices = @transform_3, window_bounds = array<i64: 64, 128>}, {pipeline_mode = #tpu.pipeline_mode<synchronous>, transform_indices = @transform_4, window_bounds = array<i64: 32, 128>}, {pipeline_mode = #tpu.pipeline_mode<synchronous>, transform_indices = @transform_5, window_bounds = array<i64: 2, 128>}, {pipeline_mode = #tpu.pipeline_mode<synchronous>, transform_indices = @transform_6, window_bounds = array<i64: 1, 128>}, {pipeline_mode = #tpu.pipeline_mode<synchronous>, transform_indices = @transform_7, window_bounds = array<i64: 1, 128>}, {transform_indices = @transform_8, window_bounds = array<i64: 16, 128>}]} {
    %c0 = arith.constant 0 : index
    %c0_0 = arith.constant 0 : index
    %0 = vector.load %arg1[%c0, %c0_0] : memref<16x1xi32, #tpu.memory_space<vmem>>, vector<16x1xi32>
    %c0_1 = arith.constant 0 : index
    %c0_2 = arith.constant 0 : index
    %1 = vector.load %arg4[%c0_1, %c0_2] : memref<64x128xbf16, #tpu.memory_space<vmem>>, vector<64x128xbf16>
    %2 = tpu.iota {dimensions = array<i32: 1>} : vector<16x64xi32>
    %3 = vector.broadcast %0 : vector<16x1xi32> to vector<16x64xi32>
    %4 = arith.cmpi eq, %3, %2 : vector<16x64xi32>
    %cst = arith.constant 1.000000e+00 : f32
    %cst_3 = arith.constant 0.000000e+00 : f32
    %5 = vector.broadcast %cst : f32 to vector<16x64xf32>
    %6 = vector.broadcast %cst_3 : f32 to vector<16x64xf32>
    %7 = arith.select %4, %5, %6 : vector<16x64xi1>, vector<16x64xf32>
    %8 = arith.truncf %7 : vector<16x64xf32> to vector<16x64xbf16>
    %cst_4 = arith.constant dense<0.000000e+00> : vector<16x128xf32>
    %9 = tpu.matmul %8, %1, %cst_4 {dimension_numbers = #tpu.dot_dimension_numbers<[1], [0], [0], [1], [0, 0, 1, 1], [], []>} : vector<16x64xbf16>, vector<64x128xbf16>, vector<16x128xf32> -> vector<16x128xf32>
    %c0_5 = arith.constant 0 : index
    %c0_6 = arith.constant 0 : index
    %10 = vector.load %arg3[%c0_5, %c0_6] : memref<16x1xi32, #tpu.memory_space<vmem>>, vector<16x1xi32>
    %c0_7 = arith.constant 0 : index
    %c0_8 = arith.constant 0 : index
    %11 = vector.load %arg5[%c0_7, %c0_8] : memref<32x128xbf16, #tpu.memory_space<vmem>>, vector<32x128xbf16>
    %12 = tpu.iota {dimensions = array<i32: 1>} : vector<16x32xi32>
    %13 = vector.broadcast %10 : vector<16x1xi32> to vector<16x32xi32>
    %14 = arith.cmpi eq, %13, %12 : vector<16x32xi32>
    %cst_9 = arith.constant 1.000000e+00 : f32
    %cst_10 = arith.constant 0.000000e+00 : f32
    %15 = vector.broadcast %cst_9 : f32 to vector<16x32xf32>
    %16 = vector.broadcast %cst_10 : f32 to vector<16x32xf32>
    %17 = arith.select %14, %15, %16 : vector<16x32xi1>, vector<16x32xf32>
    %18 = arith.truncf %17 : vector<16x32xf32> to vector<16x32xbf16>
    %cst_11 = arith.constant dense<0.000000e+00> : vector<16x128xf32>
    %19 = tpu.matmul %18, %11, %cst_11 {dimension_numbers = #tpu.dot_dimension_numbers<[1], [0], [0], [1], [0, 0, 1, 1], [], []>} : vector<16x32xbf16>, vector<32x128xbf16>, vector<16x128xf32> -> vector<16x128xf32>
    %20 = arith.addf %9, %19 : vector<16x128xf32>
    %c0_12 = arith.constant 0 : index
    %c0_13 = arith.constant 0 : index
    %21 = vector.load %arg2[%c0_12, %c0_13] : memref<16x1xi32, #tpu.memory_space<vmem>>, vector<16x1xi32>
    %c0_14 = arith.constant 0 : index
    %c0_15 = arith.constant 0 : index
    %22 = vector.load %arg6[%c0_14, %c0_15] : memref<2x128xbf16, #tpu.memory_space<vmem>>, vector<2x128xbf16>
    %23 = arith.extf %22 : vector<2x128xbf16> to vector<2x128xf32>
    %c0_i32 = arith.constant 0 : i32
    %24 = vector.broadcast %c0_i32 : i32 to vector<16x1xi32>
    %25 = arith.cmpi eq, %21, %24 : vector<16x1xi32>
    %cst_16 = arith.constant 1.000000e+00 : f32
    %cst_17 = arith.constant 0.000000e+00 : f32
    %26 = vector.broadcast %cst_16 : f32 to vector<16x1xf32>
    %27 = vector.broadcast %cst_17 : f32 to vector<16x1xf32>
    %28 = arith.select %25, %26, %27 : vector<16x1xi1>, vector<16x1xf32>
    %29 = vector.extract_strided_slice %23 {offsets = [0, 0], sizes = [1, 128], strides = [1, 1]} : vector<2x128xf32> to vector<1x128xf32>
    %30 = vector.broadcast %28 : vector<16x1xf32> to vector<16x128xf32>
    %31 = vector.broadcast %29 : vector<1x128xf32> to vector<16x128xf32>
    %32 = arith.mulf %30, %31 : vector<16x128xf32>
    %33 = arith.addf %20, %32 : vector<16x128xf32>
    %c1_i32 = arith.constant 1 : i32
    %34 = vector.broadcast %c1_i32 : i32 to vector<16x1xi32>
    %35 = arith.cmpi eq, %21, %34 : vector<16x1xi32>
    %cst_18 = arith.constant 1.000000e+00 : f32
    %cst_19 = arith.constant 0.000000e+00 : f32
    %36 = vector.broadcast %cst_18 : f32 to vector<16x1xf32>
    %37 = vector.broadcast %cst_19 : f32 to vector<16x1xf32>
    %38 = arith.select %35, %36, %37 : vector<16x1xi1>, vector<16x1xf32>
    %39 = vector.extract_strided_slice %23 {offsets = [1, 0], sizes = [1, 128], strides = [1, 1]} : vector<2x128xf32> to vector<1x128xf32>
    %40 = vector.broadcast %38 : vector<16x1xf32> to vector<16x128xf32>
    %41 = vector.broadcast %39 : vector<1x128xf32> to vector<16x128xf32>
    %42 = arith.mulf %40, %41 : vector<16x128xf32>
    %43 = arith.addf %33, %42 : vector<16x128xf32>
    %cst_20 = arith.constant dense<0.000000e+00> : vector<16xf32>
    %44 = vector.multi_reduction <add>, %43, %cst_20 [1] : vector<16x128xf32> to vector<16xf32>
    %45 = vector.shape_cast %44 : vector<16xf32> to vector<16x1xf32>
    %cst_21 = arith.constant 1.280000e+02 : f32
    %46 = vector.broadcast %cst_21 : f32 to vector<16x1xf32>
    %47 = arith.divf %45, %46 : vector<16x1xf32>
    %48 = vector.broadcast %47 : vector<16x1xf32> to vector<16x128xf32>
    %49 = arith.subf %43, %48 : vector<16x128xf32>
    %50 = arith.mulf %49, %49 : vector<16x128xf32>
    %cst_22 = arith.constant dense<0.000000e+00> : vector<16xf32>
    %51 = vector.multi_reduction <add>, %50, %cst_22 [1] : vector<16x128xf32> to vector<16xf32>
    %52 = vector.shape_cast %51 : vector<16xf32> to vector<16x1xf32>
    %cst_23 = arith.constant 1.280000e+02 : f32
    %53 = vector.broadcast %cst_23 : f32 to vector<16x1xf32>
    %54 = arith.divf %52, %53 : vector<16x1xf32>
    %cst_24 = arith.constant 9.99999996E-13 : f32
    %55 = vector.broadcast %cst_24 : f32 to vector<16x1xf32>
    %56 = arith.addf %54, %55 : vector<16x1xf32>
    %57 = math.rsqrt %56 : vector<16x1xf32>
    %58 = vector.broadcast %57 : vector<16x1xf32> to vector<16x128xf32>
    %59 = arith.mulf %49, %58 : vector<16x128xf32>
    %c0_25 = arith.constant 0 : index
    %c0_26 = arith.constant 0 : index
    %60 = vector.load %arg7[%c0_25, %c0_26] : memref<1x128xf32, #tpu.memory_space<vmem>>, vector<1x128xf32>
    %61 = vector.broadcast %60 : vector<1x128xf32> to vector<16x128xf32>
    %62 = arith.mulf %59, %61 : vector<16x128xf32>
    %c0_27 = arith.constant 0 : index
    %c0_28 = arith.constant 0 : index
    %63 = vector.load %arg8[%c0_27, %c0_28] : memref<1x128xf32, #tpu.memory_space<vmem>>, vector<1x128xf32>
    %64 = vector.broadcast %63 : vector<1x128xf32> to vector<16x128xf32>
    %65 = arith.addf %62, %64 : vector<16x128xf32>
    %c0_29 = arith.constant 0 : index
    %c0_30 = arith.constant 0 : index
    %66 = vector.load %arg9[%c0_29, %c0_30] : memref<16x128xf32, #tpu.memory_space<vmem>>, vector<16x128xf32>
    tpu.vector_store %arg9[%c0_29, %c0_30], %65 {strides = array<i32>} : memref<16x128xf32, #tpu.memory_space<vmem>>, vector<16x128xf32>,
    return
  }
  func.func @transform_0(%arg0: i32) -> (i32, i32) {
    %c0_i32 = arith.constant 0 : i32
    %c0_i32_0 = arith.constant 0 : i32
    return %arg0, %c0_i32 : i32, i32
  }
  func.func @transform_1(%arg0: i32) -> (i32, i32) {
    %c0_i32 = arith.constant 0 : i32
    %c0_i32_0 = arith.constant 0 : i32
    return %arg0, %c0_i32 : i32, i32
  }
  func.func @transform_2(%arg0: i32) -> (i32, i32) {
    %c0_i32 = arith.constant 0 : i32
    %c0_i32_0 = arith.constant 0 : i32
    return %arg0, %c0_i32 : i32, i32
  }
  func.func @transform_3(%arg0: i32) -> (i32, i32) {
    %c0_i32 = arith.constant 0 : i32
    %c0_i32_0 = arith.constant 0 : i32
    %c0_i32_1 = arith.constant 0 : i32
    return %c0_i32, %c0_i32_0 : i32, i32
  }
  func.func @transform_4(%arg0: i32) -> (i32, i32) {
    %c0_i32 = arith.constant 0 : i32
    %c0_i32_0 = arith.constant 0 : i32
    %c0_i32_1 = arith.constant 0 : i32
    return %c0_i32, %c0_i32_0 : i32, i32
  }
  func.func @transform_5(%arg0: i32) -> (i32, i32) {
    %c0_i32 = arith.constant 0 : i32
    %c0_i32_0 = arith.constant 0 : i32
    %c0_i32_1 = arith.constant 0 : i32
    return %c0_i32, %c0_i32_0 : i32, i32
  }
  func.func @transform_6(%arg0: i32) -> (i32, i32) {
    %c0_i32 = arith.constant 0 : i32
    %c0_i32_0 = arith.constant 0 : i32
    %c0_i32_1 = arith.constant 0 : i32
    return %c0_i32, %c0_i32_0 : i32, i32
  }
  func.func @transform_7(%arg0: i32) -> (i32, i32) {
    %c0_i32 = arith.constant 0 : i32
    %c0_i32_0 = arith.constant 0 : i32
    %c0_i32_1 = arith.constant 0 : i32
    return %c0_i32, %c0_i32_0 : i32, i32
  }
  func.func @transform_8(%arg0: i32) -> (i32, i32) {
    %c0_i32 = arith.constant 0 : i32
    %c0_i32_0 = arith.constant 0 : i32
    return %arg0, %c0_i32 : i32, i32
  }
}

</mosaic_0001>

<bundles_post_ra>
// kernel: tpu_custom_call.1
= control target key start
LH: loop header
LB: loop body
LE: loop exit
PB: predicated region body
PF: predicated region fallthrough
CT: control target
= control target key end

     0   :  { %v394_v2 = vmov 0   ;;  %v395_v7 = vmov 0.0   ;;  %vm396_vm4 = vmmov 0   ;;  %s502_s0 = inlined_call_operand.vmem [shape: s32[16,1], index: 0, kind: input, shape index: {}]   ;;  %s503_s1 = inlined_call_operand.vmem [shape: s32[16,1], index: 1, kind: input, shape index: {}]   ;;  %s504_s2 = inlined_call_operand.vmem [shape: s32[16,1], index: 2, kind: input, shape index: {}]   ;;  %s505_s3 = inlined_call_operand.vmem [shape: bf16[64,128], index: 3, kind: input, shape index: {}]   ;;  %s506_s4 = inlined_call_operand.vmem [shape: bf16[32,128], index: 4, kind: input, shape index: {}]   ;;  %s507_s5 = inlined_call_operand.vmem [shape: bf16[2,128], index: 5, kind: input, shape index: {}]   ;;  %s508_s6 = inlined_call_operand.vmem [shape: f32[1,128], index: 6, kind: input, shape index: {}]   ;;  %s509_s7 = inlined_call_operand.vmem [shape: f32[1,128], index: 7, kind: input, shape index: {}]   ;;  %s510_s8 = inlined_call_operand.hbm [shape: f32[16,128], index: 8, kind: output, shape index: {}]  }
   0x1   :  { %v54_v0 = vld [vmem:[%s504_s2] sm:$0xff]  ;;  %349 = vset.pattern.permute.xlu1 %v394_v2  ;;  %348 = vset.pattern.permute.xlu0 %v394_v2  ;;  %v55_v3 = vld [vmem:[%s504_s2 + $0x8] sm:$0xff] }
   0x2   :  { %v31_v1 = vld [vmem:[%s502_s0] sm:$0xff]  ;;  %v32_v4 = vld [vmem:[%s502_s0 + $0x8] sm:$0xff]  ;;  %61 = vperm.xlu1 %349, %v54_v0   ;;  %330 = vmatprep.subr.bf16.mxu1 %v395_v7 }
   0x3   :  { %v197_v5 = vld [vmem:[%s503_s1] sm:$0xff]  ;;  %v198_v6 = vld [vmem:[%s503_s1 + $0x8] sm:$0xff]  ;;  %44 = vperm.xlu0 %348, %v31_v1   ;;  %322 = vmatprep.subr.bf16.mxu0 %v395_v7 }
   0x4   :  { %vm223_vm0 = vcmp.eq.s32.totalorder %v197_v5, 1  ;;  %vm224_vm1 = vcmp.eq.s32.totalorder %v198_v6, 1  ;;  %vm201_vm2 = vcmp.eq.s32.totalorder %v197_v5, 0  ;;  %vm202_vm3 = vcmp.eq.s32.totalorder %v198_v6, 0  ;;  %v360_v12 = vld [vmem:[%s505_s3] sm:$0xff]   ;;  %v361_v16 = vld [vmem:[%s505_s3 + $0x8] sm:$0xff]   ;;  %326 = vmatprep.mubr.msk.bf16.mxu0 %vm396_vm4, %v395_v7 }
   0x5   :  { %v225_v8 = vsel %vm223_vm0, 1.0, %v395_v7  ;;  %v226_v9 = vsel %vm224_vm1, 1.0, %v395_v7  ;;  %v203_v10 = vsel %vm201_vm2, 1.0, %v395_v7  ;;  %v204_v11 = vsel %vm202_vm3, 1.0, %v395_v7  ;;  %v362_v15 = vld [vmem:[%s506_s4] sm:$0xff]   ;;  %331 = vmatpush3.bf16.msra.mxu1 %v360_v12  ;;  %v364_v17 = vld [vmem:[%s506_s4 + $0x8] sm:$0xff]  }
   0x6   :  { %64 = vperm.xlu1 %349, %v55_v3   ;;  %v355_v13 = vpack.i.bf16 %v226_v9, %v225_v8  ;;  %v350_v14 = vpack.i.bf16 %v204_v11, %v203_v10  ;;  %332 = vmatprep.subr.bf16.mxu1 %v395_v7 }
   0x7   :  { %47 = vperm.xlu0 %348, %v32_v4   ;;  %323 = vmatpush3.bf16.msra.mxu0 %v362_v15 }
   0x8   :  { %324 = vmatprep.subr.bf16.mxu0 %v395_v7 }
   0xa   :  { %356 = vperm.xlu1 %349, %v355_v13  }
   0xb   :  { %351 = vperm.xlu0 %348, %v350_v14  }
   0xc   :  { %13 = vsyncpa [#allocation3], 0  ;;  %333 = vmatpush3.bf16.msra.mxu1 %v361_v16  ;;  %v363_v18 = vld [vmem:[%s505_s3 + $0x10] sm:$0xff]   ;;  %338 = vmatprep.mubr.msk.bf16.mxu1 %vm396_vm4, %v395_v7  ;;  %v365_v19 = vld [vmem:[%s505_s3 + $0x18] sm:$0xff]   ;;  %v41_v20 = vlaneseq  ;;  %vm83_vm9 = vcmask 261120   ;;  %vm152_vm10 = vcmask 523264  }
   0xd   :  { %334 = vmatprep.subr.bf16.mxu1 %v395_v7  ;;  %325 = vmatpush3.bf16.msra.mxu0 %v364_v17  ;;  %v199_v33 = vld [vmem:[%s507_s5] sm:$0x1]  ;;  %s397_s29 = smov [#allocation2]  }
   0xe   :  { %v42_v21 = vand.u32 127, %v41_v20  ;;  %v216_v32 = vshrl.u32 %v41_v20, 7  ;;  %v200_v34 = vunpack.c.l.bf16 %v199_v33  ;;  %v312_v14 = vld [vmem:[%s508_s6] ss:$0 sm:$0xff]  ;;  %s293_s30 = sshll.u32 %s397_s29, 4  ;;  %s294_s30 = int_to_ptr.vmem [resolvable:$true] %s293_s30 }
   0xf   :  { %v313_v16 = vld [vmem:[%s509_s7] ss:$0 sm:$0xff]  ;;  %s370_s9 = scalar_lea.vmem %s294_s30, 256  ;;  %p375_p1 = scmp.lt.s32.totalorder %s294_s30, %s294_s30 }
  0x10   :  { %335 = vmatpush3.bf16.msra.mxu1 %v363_v18  ;;  %v217_v35 = vsub.s32 0, %v216_v32  ;;  %v239_v37 = vsub.s32 1, %v216_v32  ;;  %p371_p0 = scmp.ne.s32.totalorder %s294_s30, %s370_s9  ;;  %p376_p2 = scmp.lt.s32.totalorder %s370_s9, %s370_s9 }
  0x11   :  { %336 = vmatprep.subr.bf16.mxu1 %v395_v7 }
  0x12   :  { %v218_v39 = vrot.slane %v200_v34, %v217_v35  ;;  %v240_v43 = vrot.slane %v200_v34, %v239_v37  ;;  %p377_p3 = por %p376_p2, %p375_p1 }
  0x14   :  { %337 = vmatpush3.bf16.msra.mxu1 %v365_v19  ;;  %p378_p4 = pnand %p377_p3, %p371_p0 }
  0x81   :  { %v62_v22 = vpop.permute.xlu1 %61 }
  0x82   :  { %v45_v23 = vpop.permute.xlu0 %44  ;;  %vm66_vm5 = vcmp.eq.s32.totalorder %v62_v22, %v42_v21 }
  0x83   :  { %vm49_vm6 = vcmp.eq.s32.totalorder %v45_v23, %v42_v21  ;;  %v68_v26 = vsel %vm66_vm5, 1.0, %v395_v7 }
  0x84   :  { %v51_v27 = vsel %vm49_vm6, 1.0, %v395_v7 }
  0x85   :  { %v65_v24 = vpop.permute.xlu1 %64 }
  0x86   :  { %v48_v25 = vpop.permute.xlu0 %47  ;;  %vm67_vm7 = vcmp.eq.s32.totalorder %v65_v24, %v42_v21 }
  0x87   :  { %vm50_vm8 = vcmp.eq.s32.totalorder %v48_v25, %v42_v21  ;;  %v69_v28 = vsel %vm67_vm7, 1.0, %v395_v7 }
  0x88   :  { %v52_v29 = vsel %vm50_vm8, 1.0, %v395_v7  ;;  %v70_v30 = vpack.c.bf16 %v69_v28, %v68_v26 }
  0x89   :  { %v53_v31 = vpack.c.bf16 %v52_v29, %v51_v27  ;;  %v357_v38 = vpop.permute.xlu1 %356 }
  0x8a   :  { %327 = vmatmul.mubr.msk.bf16.vlgmr.msra.gmra.mrb[0].mxu0 %vm83_vm9, %v70_v30  ;;  %v352_v36 = vpop.permute.xlu0 %351  ;;  %v358_v41 = vunpack.i.l.bf16 %v357_v38  ;;  %v359_v46 = vunpack.i.h.bf16 %v357_v38 }
  0x8b   :  { %339 = vmatmul.mubr.msk.bf16.vlgmr.msra.gmra.mrb[0].mxu1 %vm152_vm10, %v53_v31  ;;  %v353_v40 = vunpack.i.l.bf16 %v352_v36  ;;  %v354_v42 = vunpack.i.h.bf16 %v352_v36 }
  0x8c   :  { %v241_v58 = vmul.f32 %v358_v41, %v240_v43  ;;  %v242_v61 = vmul.f32 %v359_v46, %v240_v43 }
  0x8d   :  { %v219_v47 = vmul.f32 %v353_v40, %v218_v39  ;;  %v220_v53 = vmul.f32 %v354_v42, %v218_v39 }
 0x15d   :  { %v121_v44 = vpop.f32.mrb[0].mxu0 }
 0x15e   :  { %v190_v45 = vpop.f32.mrb[0].mxu1  ;;  %v328_v49 = vpop.f32.mrb[1].mxu0 }
 0x15f   :  { %v191_v48 = vadd.f32 %v190_v45, %v121_v44  ;;  %v340_v50 = vpop.f32.mrb[1].mxu1  ;;  %v124_v51 = vpop.f32.mrb[2].mxu0 }
 0x160   :  { %v193_v52 = vpop.f32.mrb[2].mxu1  ;;  %v329_v56 = vpop.f32.mrb[3].mxu0 }
 0x161   :  { %v221_v54 = vadd.f32 %v219_v47, %v191_v48  ;;  %v194_v55 = vadd.f32 %v193_v52, %v124_v51  ;;  %v341_v57 = vpop.f32.mrb[3].mxu1 }
 0x163   :  { %v222_v59 = vadd.f32 %v220_v53, %v194_v55  ;;  %v243_v60 = vadd.f32 %v241_v58, %v221_v54 }
 0x165   :  { %245 = vadd.xlane.f32.xlu0 %v243_v60  ;;  %v244_v62 = vadd.f32 %v242_v61, %v222_v59 }
 0x167   :  { %247 = vadd.xlane.f32.xlu1 %v244_v62 }
 0x1f2   :  { %v246_v63 = vpop.xlane.xlu0 %245 }
 0x1f3   :  { %v250_v0 = vmul.f32 0.0078125, %v246_v63 }
 0x1f4   :  { %v248_v1 = vpop.xlane.xlu1 %247 }
 0x1f5   :  { %v252_v2 = vsub.f32 %v243_v60, %v250_v0  ;;  %v251_v3 = vmul.f32 0.0078125, %v248_v1 }
 0x1f7   :  { %v253_v4 = vsub.f32 %v244_v62, %v251_v3  ;;  %v254_v5 = vmul.f32 %v252_v2, %v252_v2 }
 0x1f9   :  { %256 = vadd.xlane.f32.xlu0 %v254_v5  ;;  %v255_v6 = vmul.f32 %v253_v4, %v253_v4 }
 0x1fd   :  { %258 = vadd.xlane.f32.xlu0 %v255_v6 }
 0x286   :  { %v257_v7 = vpop.xlane.xlu0 %256 }
 0x287   :  { %v260_v8 = vmul.f32 0.0078125, %v257_v7 }
 0x289   :  { %v262_v9 = vadd.f32 1e-12, %v260_v8 }
 0x28a   :  { %v259_v10 = vpop.xlane.xlu0 %258 }
 0x28b   :  { %366 = vrsqrt.f32 %v262_v9  ;;  %v261_v11 = vmul.f32 0.0078125, %v259_v10 }
 0x28d   :  { %v263_v12 = vadd.f32 1e-12, %v261_v11 }
 0x28f   :  { %368 = vrsqrt.f32 %v263_v12 }
 0x295   :  { %v367_v13 = vpop.eup %366 }
 0x296   :  { %v266_v15 = vmul.f32 %v367_v13, %v252_v2 }
 0x298   :  { %v275_v17 = vmul.f32 %v312_v14, %v266_v15 }
 0x299   :  { %v369_v18 = vpop.eup %368 }
 0x29a   :  { %v267_v19 = vmul.f32 %v369_v18, %v253_v4  ;;  %v284_v20 = vadd.f32 %v313_v16, %v275_v17 }
 0x29c   :  { %v276_v21 = vmul.f32 %v312_v14, %v267_v19  ;;  %286 = vst [vmem:[#allocation2] sm:$0xff] %v284_v20 }
 0x29e   :  { %v285_v22 = vadd.f32 %v313_v16, %v276_v21 }
 0x2a0   :  { %287 = vst [vmem:[#allocation2 + $0x8] sm:$0xff] %v285_v22 }
 0x2a1   :  { %381 = shalt.err (!%p378_p4)
}
 0x2a2   :  { %s382_s10 = scalar_lea.hbm %s510_s8, 256 }
 0x2a3   :  { %p383_p5 = scmp.ne.s32.totalorder %s510_s8, %s382_s10  ;;  %p386_p6 = scmp.lt.u32.totalorder %s382_s10, %s510_s8 }
 0x2a5   :  { %p388_p7 = pnand %p386_p6, %p383_p5 }
 0x2a7   :  { %391 = shalt.err (!%p388_p7)
}
 0x2a8   :  { %s398_s15 = smov 128   ;;  %s399_s16 = smov 8  }
 0x2a9   :  { %299 = dma.vmem_to_hbm [thread:$0]  %s294_s30, 256, %s510_s8, [#allocation3], %s398_s15, %s398_s15, %s399_s16  }
 0x2aa   :  { %392 = dma.done.wait [#allocation3], 256  }
 0x2ab   :  { %393 = vsyncadd [#allocation3], 4294967040 }
 0x2ac   :  { %303 = vsyncpa [#allocation3], 1 }

</bundles_post_ra>
